<compile_context>
chip_gen: v6e
topology: v6e:2x2x1
jax: 0.10.0
libtpu: 0.0.40
codegen_flags: <defaults>
</compile_context>

<pallas_src>
import functools

import jax
import jax.numpy as jnp
from jax import lax
from jax.experimental import pallas as pl
from jax.experimental.pallas import tpu as pltpu

_MIB = 1024 * 1024


# ---------------------------------------------------------------------------
# hardware-aware sizing helpers
# ---------------------------------------------------------------------------

def _vmem_capacity_bytes():
    """Physical VMEM per core (generation-aware), with a v7x-safe fallback."""
    try:
        info = pltpu.get_tpu_info()
        cap = int(getattr(info, "vmem_capacity_bytes", 0) or 0)
        if cap > 0:
            return max(32 * _MIB, min(cap, 128 * _MIB))
    except Exception:
        pass
    return 64 * _MIB  # v7x-safe default; conservative-but-fine on v5e/v6e


def _choose_tile_n(n, c, itemsize, vmem_cap):
    """Row tile targeting ~4 MiB of logits per grid step (HBM-roofline
    territory), bounded so the working set (double-buffered input + f32
    intermediates) stays well inside this generation's VMEM."""
    sub = 8 if itemsize >= 4 else 16          # sublane pack (f32 / bf16)
    if n <= sub:
        return max(1, n)                      # full-extent block: always legal
    n_floor = (n // sub) * sub
    # per-row bytes: 2x tile (double-buffered input) + ~5x f32 temps
    # (x.astype, exp, one-hot iota, reduction temps) Mosaic keeps live.
    per_row = 2 * c * itemsize + 5 * c * 4 + 32
    vmem_rows = max(sub, (vmem_cap // 2) // per_row)
    target_rows = max(sub, (4 * _MIB) // max(1, c * itemsize))
    tile = min(vmem_rows, target_rows, 8192, n_floor)
    tile = max(sub, (tile // sub) * sub)
    # Keep >= 2 grid steps when there's enough work so ("parallel",) can
    # actually shard across both TensorCores on v7x.
    if tile >= n and n >= 1024:
        half = (((n + 1) // 2 + sub - 1) // sub) * sub
        tile = max(sub, min(tile, half))
    return tile


# ---------------------------------------------------------------------------
# kernels
# ---------------------------------------------------------------------------

def _rowwise_terms(x_ref, t_ref):
    """Per-row smoothing and NLL terms without materializing log_preds.

    smooth_row = -sum_c log_softmax(x) = C * logsumexp(x) - sum_c x
    nll_row    = -log_softmax(x)[t]    =     logsumexp(x) - x[t]
    """
    x = x_ref[...].astype(jnp.float32)                        # (TN, C)
    c = x.shape[-1]
    m = jnp.max(x, axis=-1, keepdims=True)                    # (TN, 1)
    lse = m + jnp.log(jnp.sum(jnp.exp(x - m), axis=-1, keepdims=True))
    row_sum = jnp.sum(x, axis=-1, keepdims=True)              # (TN, 1)
    smooth_rows = c * lse - row_sum
    cls_ids = lax.broadcasted_iota(jnp.int32, x.shape, 1)     # (TN, C)
    x_tgt = jnp.sum(jnp.where(cls_ids == t_ref[...], x, 0.0),
                    axis=-1, keepdims=True)                   # (TN, 1)
    nll_rows = lse - x_tgt
    return smooth_rows, nll_rows, c


def _ls_partial_kernel(x_ref, t_ref, part_ref, *, n_rows, tile_n, eps):
    """mean/sum path: one combined per-tile partial sum (single tiny store).

    x_ref: (tile_n, C) logits; t_ref: (tile_n, 1) int32 targets;
    part_ref: (1, 1) per-tile partial of eps/C*smooth + (1-eps)*nll.
    """
    i = pl.program_id(0)
    smooth_rows, nll_rows, c = _rowwise_terms(x_ref, t_ref)
    combined = (eps / c) * smooth_rows + (1.0 - eps) * nll_rows   # (TN, 1)

    # Mask rows beyond the true N (non-dividing final block reads garbage;
    # everything above is per-row, so the mask neutralizes it completely).
    row_ids = i * tile_n + lax.broadcasted_iota(jnp.int32, (tile_n, 1), 0)
    combined = jnp.where(row_ids < n_rows, combined, 0.0)

    part_ref[...] = jnp.sum(combined, axis=0, keepdims=True)      # (1, 1)


def _ls_perrow_kernel(x_ref, t_ref, loss_ref, *, eps):
    """reduction='none' path: fused per-row loss (Pallas masks the partial
    final output block, so garbage rows never reach HBM)."""
    smooth_rows, nll_rows, c = _rowwise_terms(x_ref, t_ref)
    loss_ref[...] = (eps / c) * smooth_rows + (1.0 - eps) * nll_rows


# ---------------------------------------------------------------------------
# wrapper
# ---------------------------------------------------------------------------

@functools.partial(jax.jit, static_argnames=("eps", "reduction", "tile_n"))
def label_smoothing_cross_entropy(output, target, eps=0.1, reduction="mean",
                                  tile_n=None):
    """output: (N, C) float logits (f32 or bf16), target: (N,) int class ids."""
    n, c = output.shape
    itemsize = int(jnp.dtype(output.dtype).itemsize)
    vmem_cap = _vmem_capacity_bytes()
    if tile_n is None:
        tile_n = _choose_tile_n(n, c, itemsize, vmem_cap)
    tile_n = int(min(tile_n, max(n, 1)))          # never exceed the array extent
    num_tiles = pl.cdiv(n, tile_n)

    t2d = target.astype(jnp.int32).reshape(n, 1)

    logits_spec = pl.BlockSpec((tile_n, c), lambda i: (i, 0))
    target_spec = pl.BlockSpec((tile_n, 1), lambda i: (i, 0))

    cparams = pltpu.CompilerParams(
        dimension_semantics=("parallel",),
        vmem_limit_bytes=int(vmem_cap * 3 // 4))
    cost = pl.CostEstimate(
        flops=int(6 * n * c),
        transcendentals=int(n * c),
        bytes_accessed=int(n * c * itemsize + 8 * n))

    if reduction in ("mean", "sum"):
        kern = functools.partial(_ls_partial_kernel, n_rows=n, tile_n=tile_n,
                                 eps=float(eps))
        partials = pl.pallas_call(
            kern,
            out_shape=jax.ShapeDtypeStruct((num_tiles, 1), jnp.float32),
            grid_spec=pltpu.PrefetchScalarGridSpec(
                num_scalar_prefetch=0,
                grid=(num_tiles,),
                in_specs=[logits_spec, target_spec],
                out_specs=pl.BlockSpec((1, 1), lambda i: (i, 0)),
            ),
            compiler_params=cparams,
            cost_estimate=cost,
        )(output, t2d)
        total = jnp.sum(partials)
        return total / n if reduction == "mean" else total

    if reduction != "none":
        raise ValueError(f"unsupported reduction: {reduction!r}")

    kern = functools.partial(_ls_perrow_kernel, eps=float(eps))
    loss_rows = pl.pallas_call(
        kern,
        out_shape=jax.ShapeDtypeStruct((n, 1), jnp.float32),
        grid_spec=pltpu.PrefetchScalarGridSpec(
            num_scalar_prefetch=0,
            grid=(num_tiles,),
            in_specs=[logits_spec, target_spec],
            out_specs=pl.BlockSpec((tile_n, 1), lambda i: (i, 0)),
        ),
        compiler_params=cparams,
        cost_estimate=cost,
    )(output, t2d)
    return loss_rows[:, 0]


# ---------------------------------------------------------------------------
# pure-JAX reference of the PyTorch forward
# ---------------------------------------------------------------------------

def _reference(output, target, eps=0.1, reduction="mean"):
    c = output.shape[-1]
    log_preds = jax.nn.log_softmax(output.astype(jnp.float32), axis=-1)
    nll = -jnp.take_along_axis(
        log_preds, target.astype(jnp.int32)[:, None], axis=-1)[:, 0]
    if reduction == "sum":
        loss = -jnp.sum(log_preds)
        nll = jnp.sum(nll)
    elif reduction == "mean":
        loss = jnp.mean(-jnp.sum(log_preds, axis=-1))
        nll = jnp.mean(nll)
    else:  # 'none'
        loss = -jnp.sum(log_preds, axis=-1)
    return loss * eps / c + (1.0 - eps) * nll


if __name__ == "__main__":
    key = jax.random.PRNGKey(0)
    k1, k2, k3, k4, k5, k6 = jax.random.split(key, 6)

    # Case 1: small module-consistent shape, default 'mean' reduction.
    N, C = 8, 32
    logits = jax.random.normal(k1, (N, C), dtype=jnp.float32)
    target = jax.random.randint(k2, (N,), 0, C, dtype=jnp.int32)
    loss = jax.block_until_ready(
        label_smoothing_cross_entropy(logits, target, eps=0.1, reduction="mean"))
    ref = _reference(logits, target, eps=0.1, reduction="mean")
    assert jnp.allclose(loss, ref, rtol=2e-5, atol=2e-5), (loss, ref)

    # Case 2: multi-tile grid with a non-dividing final tile (no wrapper
    # padding anymore), all three reductions.
    N2, C2 = 50, 33
    logits2 = jax.random.normal(k3, (N2, C2), dtype=jnp.float32)
    target2 = jax.random.randint(k4, (N2,), 0, C2, dtype=jnp.int32)
    for red in ("mean", "sum", "none"):
        got = jax.block_until_ready(
            label_smoothing_cross_entropy(
                logits2, target2, eps=0.1, reduction=red, tile_n=16))
        want = _reference(logits2, target2, eps=0.1, reduction=red)
        assert jnp.allclose(got, want, rtol=1e-4, atol=1e-4), (red, got, want)

    # Case 3: bf16 logits on the wire (kernel math stays f32), auto tile size,
    # partial final block.
    N3, C3 = 24, 64
    logits3 = jax.random.normal(k5, (N3, C3), dtype=jnp.float32).astype(jnp.bfloat16)
    target3 = jax.random.randint(k6, (N3,), 0, C3, dtype=jnp.int32)
    got3 = jax.block_until_ready(
        label_smoothing_cross_entropy(logits3, target3, eps=0.1, reduction="mean"))
    want3 = _reference(logits3, target3, eps=0.1, reduction="mean")
    assert jnp.allclose(got3, want3, rtol=2e-4, atol=2e-4), (got3, want3)

    print("KERNEL_OK")
</pallas_src>

<mosaic_0001>
module attributes {stable_mosaic.version = 11 : i64} {
  func.func @_ls_partial_kernel(%arg0: i32, %arg1: memref<8x32xf32, #tpu.memory_space<vmem>>, %arg2: memref<8x1xi32, #tpu.memory_space<vmem>>, %arg3: memref<1x1xf32, #tpu.memory_space<vmem>>) attributes {dimension_semantics = [#tpu.dimension_semantics<parallel>], iteration_bounds = array<i64: 1>, scalar_prefetch = 0 : i64, scratch_operands = 0 : i64, tpu.core_type = #tpu.core_type<tc>, window_params = [{transform_indices = @transform_0, window_bounds = array<i64: 8, 32>}, {transform_indices = @transform_1, window_bounds = array<i64: 8, 1>}, {transform_indices = @transform_2, window_bounds = array<i64: 1, 1>}]} {
    %c0 = arith.constant 0 : index
    %c0_0 = arith.constant 0 : index
    %0 = vector.load %arg1[%c0, %c0_0] : memref<8x32xf32, #tpu.memory_space<vmem>>, vector<8x32xf32>
    %cst = arith.constant dense<0xFF800000> : vector<8xf32>
    %1 = vector.multi_reduction <maximumf>, %0, %cst [1] : vector<8x32xf32> to vector<8xf32>
    %2 = vector.shape_cast %1 : vector<8xf32> to vector<8x1xf32>
    %3 = vector.broadcast %2 : vector<8x1xf32> to vector<8x32xf32>
    %4 = arith.subf %0, %3 : vector<8x32xf32>
    %5 = math.exp %4 : vector<8x32xf32>
    %cst_1 = arith.constant dense<0.000000e+00> : vector<8xf32>
    %6 = vector.multi_reduction <add>, %5, %cst_1 [1] : vector<8x32xf32> to vector<8xf32>
    %7 = vector.shape_cast %6 : vector<8xf32> to vector<8x1xf32>
    %8 = math.log %7 : vector<8x1xf32>
    %9 = arith.addf %2, %8 : vector<8x1xf32>
    %cst_2 = arith.constant dense<0.000000e+00> : vector<8xf32>
    %10 = vector.multi_reduction <add>, %0, %cst_2 [1] : vector<8x32xf32> to vector<8xf32>
    %11 = vector.shape_cast %10 : vector<8xf32> to vector<8x1xf32>
    %cst_3 = arith.constant 3.200000e+01 : f32
    %12 = vector.broadcast %cst_3 : f32 to vector<8x1xf32>
    %13 = arith.mulf %12, %9 : vector<8x1xf32>
    %14 = arith.subf %13, %11 : vector<8x1xf32>
    %15 = tpu.iota {dimensions = array<i32: 1>} : vector<8x32xi32>
    %c0_4 = arith.constant 0 : index
    %c0_5 = arith.constant 0 : index
    %16 = vector.load %arg2[%c0_4, %c0_5] : memref<8x1xi32, #tpu.memory_space<vmem>>, vector<8x1xi32>
    %17 = vector.broadcast %16 : vector<8x1xi32> to vector<8x32xi32>
    %18 = arith.cmpi eq, %15, %17 : vector<8x32xi32>
    %cst_6 = arith.constant 0.000000e+00 : f32
    %19 = vector.broadcast %cst_6 : f32 to vector<8x32xf32>
    %20 = arith.select %18, %0, %19 : vector<8x32xi1>, vector<8x32xf32>
    %cst_7 = arith.constant dense<0.000000e+00> : vector<8xf32>
    %21 = vector.multi_reduction <add>, %20, %cst_7 [1] : vector<8x32xf32> to vector<8xf32>
    %22 = vector.shape_cast %21 : vector<8xf32> to vector<8x1xf32>
    %23 = arith.subf %9, %22 : vector<8x1xf32>
    %cst_8 = arith.constant 3.125000e-03 : f32
    %24 = vector.broadcast %cst_8 : f32 to vector<8x1xf32>
    %25 = arith.mulf %24, %14 : vector<8x1xf32>
    %cst_9 = arith.constant 0.899999976 : f32
    %26 = vector.broadcast %cst_9 : f32 to vector<8x1xf32>
    %27 = arith.mulf %26, %23 : vector<8x1xf32>
    %28 = arith.addf %25, %27 : vector<8x1xf32>
    %c8_i32 = arith.constant 8 : i32
    %29 = arith.muli %arg0, %c8_i32 : i32
    %30 = tpu.iota {dimensions = array<i32: 0>} : vector<8x1xi32>
    %31 = vector.broadcast %29 : i32 to vector<8x1xi32>
    %32 = arith.addi %31, %30 : vector<8x1xi32>
    %c8_i32_10 = arith.constant 8 : i32
    %33 = vector.broadcast %c8_i32_10 : i32 to vector<8x1xi32>
    %34 = arith.cmpi slt, %32, %33 : vector<8x1xi32>
    %cst_11 = arith.constant 0.000000e+00 : f32
    %35 = vector.broadcast %cst_11 : f32 to vector<8x1xf32>
    %36 = arith.select %34, %28, %35 : vector<8x1xi1>, vector<8x1xf32>
    %cst_12 = arith.constant dense<0.000000e+00> : vector<1xf32>
    %37 = vector.multi_reduction <add>, %36, %cst_12 [0] : vector<8x1xf32> to vector<1xf32>
    %38 = vector.shape_cast %37 : vector<1xf32> to vector<1x1xf32>
    %c0_13 = arith.constant 0 : index
    %c0_14 = arith.constant 0 : index
    %39 = vector.load %arg3[%c0_13, %c0_14] : memref<1x1xf32, #tpu.memory_space<vmem>>, vector<1x1xf32>
    tpu.vector_store %arg3[%c0_13, %c0_14], %38 {strides = array<i32>} : memref<1x1xf32, #tpu.memory_space<vmem>>, vector<1x1xf32>,
    return
  }
  func.func @transform_0(%arg0: i32) -> (i32, i32) {
    %c0_i32 = arith.constant 0 : i32
    %c0_i32_0 = arith.constant 0 : i32
    return %arg0, %c0_i32 : i32, i32
  }
  func.func @transform_1(%arg0: i32) -> (i32, i32) {
    %c0_i32 = arith.constant 0 : i32
    %c0_i32_0 = arith.constant 0 : i32
    return %arg0, %c0_i32 : i32, i32
  }
  func.func @transform_2(%arg0: i32) -> (i32, i32) {
    %c0_i32 = arith.constant 0 : i32
    %c0_i32_0 = arith.constant 0 : i32
    return %arg0, %c0_i32 : i32, i32
  }
}

</mosaic_0001>

<bundles_post_ra>
// kernel: label_smoothing_cross_entropy.1
= control target key start
LH: loop header
LB: loop body
LE: loop exit
PB: predicated region body
PF: predicated region fallthrough
CT: control target
= control target key end

     0   :  { %vm13_vm0 = vcmask 261120   ;;  %s134_s0 = inlined_call_operand.vmem [shape: f32[8,32], index: 0, kind: input, shape index: {}]   ;;  %s135_s1 = inlined_call_operand.vmem [shape: s32[8,1], index: 1, kind: input, shape index: {}]   ;;  %s136_s2 = inlined_call_operand.hbm [shape: f32[1,1], index: 2, kind: output, shape index: {}]  }
   0x1   :  { %v12_v0 = vld [vmem:[%s134_s0] sm:$0xff] }
   0x2   :  { %7 = vsyncpa [#allocation3], 0  ;;  %v14_v1 = vsel %vm13_vm0, %v12_v0, -inf  ;;  %v104_v2 = vmov 0   ;;  %v33_v3 = vld [vmem:[%s135_s1] sm:$0xff]  ;;  %v31_v7 = vlaneseq  ;;  %v26_v12 = vsel %vm13_vm0, %v12_v0, 0.0 }
   0x3   :  { %77 = vset.pattern.permute.xlu0 %v104_v2  ;;  %s105_s0 = smov [#allocation2]   ;;  %vm59_vm2 = vcmask 0  }
   0x4   :  { %15 = vmax.xlane.f32.xlu0 %v14_v1  ;;  %v32_v8 = vand.u32 127, %v31_v7  ;;  %s67_s1 = sshll.u32 %s105_s0, 4  ;;  %s68_s1 = int_to_ptr.vmem [resolvable:$true] %s67_s1 }
   0x5   :  { %s82_s13 = scalar_lea.vmem %s68_s1, 16  ;;  %s86_s14 = scalar_lea.vmem %s68_s1, 32 }
   0x6   :  { %p83_p0 = scmp.ne.s32.totalorder %s68_s1, %s82_s13  ;;  %p87_p1 = scmp.lt.s32.totalorder %s68_s1, %s68_s1 }
   0x7   :  { %p88_p2 = scmp.lt.s32.totalorder %s86_s14, %s82_s13 }
   0x9   :  { %p89_p3 = por %p88_p2, %p87_p1 }
   0xb   :  { %p90_p4 = pnand %p89_p3, %p83_p0 }
  0x1a   :  { %35 = vperm.xlu0 %77, %v33_v3  }
  0x8d   :  { %v16_v4 = vpop.xlane.xlu0 %15 }
  0x8e   :  { %v17_v5 = vsub.f32 %v12_v0, %v16_v4 }
  0x90   :  { %v18_v6 = vmul.f32 1.442695, %v17_v5 }
  0x92   :  { %78 = vpow2.f32 %v18_v6 }
  0x95   :  { %v36_v9 = vpop.permute.xlu0 %35 }
  0x96   :  { %vm37_vm1 = vcmp.eq.s32.totalorder %v32_v8, %v36_v9 }
  0x97   :  { %v38_v13 = vsel %vm37_vm1, %v12_v0, 0.0 }
  0x98   :  { %v39_v14 = vsel %vm13_vm0, %v38_v13, 0.0 }
  0x9f   :  { %v79_v10 = vpop.eup %78 }
  0xa0   :  { %v20_v11 = vsel %vm13_vm0, %v79_v10, 0.0 }
  0xa1   :  { %21 = vadd.xlane.f32.xlu1 %v20_v11 }
  0xa5   :  { %27 = vadd.xlane.f32.xlu1 %v26_v12 }
  0xa9   :  { %40 = vadd.xlane.f32.xlu1 %v39_v14 }
 0x12a   :  { %v22_v15 = vpop.xlane.xlu1 %21 }
 0x12b   :  { %80 = vlog2.f32 %v22_v15 }
 0x12e   :  { %v28_v16 = vpop.xlane.xlu1 %27 }
 0x132   :  { %v41_v19 = vpop.xlane.xlu1 %40 }
 0x138   :  { %v81_v17 = vpop.eup %80 }
 0x139   :  { %v24_v18 = vmul.f32 0.6931472, %v81_v17 }
 0x13b   :  { %v25_v20 = vadd.f32 %v24_v18, %v16_v4 }
 0x13d   :  { %v29_v21 = vmul.f32 32.0, %v25_v20  ;;  %v42_v22 = vsub.f32 %v25_v20, %v41_v19 }
 0x13f   :  { %v30_v23 = vsub.f32 %v29_v21, %v28_v16  ;;  %v44_v25 = vmul.f32 0.9, %v42_v22 }
 0x141   :  { %v43_v24 = vmul.f32 0.003125, %v30_v23 }
 0x143   :  { %v45_v26 = vadd.f32 %v44_v25, %v43_v24 }
 0x145   :  { %v53_v27 = vrot.slane %v45_v26, 4 }
 0x147   :  { %v54_v28 = vadd.f32 %v53_v27, %v45_v26 }
 0x149   :  { %v55_v29 = vrot.slane %v54_v28, 2 }
 0x14b   :  { %v56_v30 = vadd.f32 %v55_v29, %v54_v28 }
 0x14d   :  { %v57_v31 = vrot.slane %v56_v30, 1 }
 0x14f   :  { %v58_v32 = vadd.f32 %v57_v31, %v56_v30 }
 0x151   :  { %60 = vst.msk [vmem:[#allocation2] sm:$0x1] %vm59_vm2, %v58_v32 }
 0x152   :  { %93 = shalt.err (!%p90_p4)
}
 0x153   :  { %70 = dma.vmem_to_hbm [thread:$0]  %s68_s1, 16, %s136_s2, [#allocation3]  }
 0x154   :  { %102 = dma.done.wait [#allocation3], 16  }
 0x155   :  { %103 = vsyncadd [#allocation3], 4294967280 }
 0x156   :  { %74 = vsyncpa [#allocation3], 1 }

</bundles_post_ra>
